<compile_context>
chip_gen: v6e
topology: v6e:2x2x1
jax: 0.10.0
libtpu: 0.0.40
codegen_flags: <defaults>
</compile_context>

<pallas_src>
import math

import jax
import jax.numpy as jnp
from jax.experimental import pallas as pl
from jax.experimental.pallas import tpu as pltpu

LANE = 128
SUBLANE = 8

# generation -> (per-block byte budget for streamed tiles, vmem_limit_bytes)
# budget * 6 (a, b, out, each double-buffered) + small resident params <= limit
_GEN_CONFIG = {
    "v7": (4 << 20, 32 << 20),   # 64 MiB physical VMEM -> ~24 MiB working set
    "v6": (8 << 20, 64 << 20),   # 128 MiB physical -> ~48 MiB working set
    "v5": (3 << 20, 32 << 20),   # raise above the 16 MiB scoped default
    "unknown": (2 << 20, 32 << 20),
}


def _tpu_generation():
    kind = ""
    try:
        kind = jax.devices()[0].device_kind.lower()
    except Exception:
        pass
    for g in ("v7", "v6", "v5"):
        if g in kind:
            return g
    return "unknown"


def _aggregation_kernel(pa_ref, pb_ref, a_ref, b_ref, o_ref):
    # Pure VPU FMA; kernel is HBM-bandwidth bound (12 B moved per 4 B output).
    # pa/pb: (8, W) VMEM-resident blocks whose 8 sublanes are identical.
    # a/b/o: (tile_rows, W) streaming tiles.
    tb, w = a_ref.shape
    if tb > SUBLANE and tb % SUBLANE == 0:
        # vreg-aligned: regroup rows into (G, 8, W) so the (8, W) param tile
        # is reused per vreg with no sublane broadcast.  The reshape only
        # regroups whole (8, lane) tiles -> layout no-op.
        g = tb // SUBLANE
        pa = pa_ref[...].reshape(1, SUBLANE, w)
        pb = pb_ref[...].reshape(1, SUBLANE, w)
        a = a_ref[...].reshape(g, SUBLANE, w)
        b = b_ref[...].reshape(g, SUBLANE, w)
        o_ref[...] = (a * pa + b * pb).reshape(tb, w)
    elif tb == SUBLANE:
        o_ref[...] = a_ref[...] * pa_ref[...] + b_ref[...] * pb_ref[...]
    elif tb < SUBLANE:
        o_ref[...] = a_ref[...] * pa_ref[0:tb, :] + b_ref[...] * pb_ref[0:tb, :]
    else:
        # Odd tile height (> 8, not a multiple of 8): row-broadcast fallback.
        o_ref[...] = a_ref[...] * pa_ref[0:1, :] + b_ref[...] * pb_ref[0:1, :]


def _pallas_agg_2d(pa, pb, a2d, b2d, *, block_budget_bytes, vmem_limit_bytes, gen):
    rows, width = a2d.shape
    itemsize = a2d.dtype.itemsize
    # Budget against the lane-padded width actually occupied in VMEM.
    w_phys = pl.cdiv(width, LANE) * LANE
    tile_rows = (block_budget_bytes // (w_phys * itemsize)) // SUBLANE * SUBLANE
    tile_rows = max(SUBLANE, tile_rows)
    if tile_rows >= rows:
        tile_rows = rows  # single block; block dims == full array dims is legal
    # Partial last block: OOB reads padded, OOB writes masked -> no wrapper pad.
    grid = pl.cdiv(rows, tile_rows)

    if gen == "v7" and grid > 1 and hasattr(pltpu, "CORE_PARALLEL"):
        # Only core_parallel actually shards the grid across v7x's 2 TCs.
        semantics = (pltpu.CORE_PARALLEL,)
    else:
        semantics = ("parallel",)

    return pl.pallas_call(
        _aggregation_kernel,
        out_shape=jax.ShapeDtypeStruct((rows, width), a2d.dtype),
        grid_spec=pltpu.PrefetchScalarGridSpec(
            num_scalar_prefetch=0,
            grid=(grid,),
            in_specs=[
                pl.BlockSpec((SUBLANE, width), lambda i: (0, 0)),    # param_a (resident)
                pl.BlockSpec((SUBLANE, width), lambda i: (0, 0)),    # param_b (resident)
                pl.BlockSpec((tile_rows, width), lambda i: (i, 0)),  # a tile
                pl.BlockSpec((tile_rows, width), lambda i: (i, 0)),  # b tile
            ],
            out_specs=pl.BlockSpec((tile_rows, width), lambda i: (i, 0)),
        ),
        compiler_params=pltpu.CompilerParams(
            dimension_semantics=semantics,
            vmem_limit_bytes=vmem_limit_bytes,
        ),
    )(pa, pb, a2d, b2d)


def aggregation_forward(param_a, param_b, a, b, *,
                        block_budget_bytes=None, vmem_limit_bytes=None):
    """param_a, param_b: (1, C); a, b: (B, C). Returns (B, C) = pa*a + pb*b."""
    B, C = a.shape
    dtype = a.dtype
    gen = _tpu_generation()
    default_budget, default_limit = _GEN_CONFIG[gen]
    budget = block_budget_bytes if block_budget_bytes is not None else default_budget
    limit = vmem_limit_bytes if vmem_limit_bytes is not None else default_limit

    pa = param_a.reshape(1, C).astype(dtype)
    pb = param_b.reshape(1, C).astype(dtype)

    # Lane-packing path: for small C, flatten row-major into a lane-dense
    # (rows, W) view with W = lcm(C, 128).  Since C | W, packed element
    # (r, w) has class index w % C, so a single pre-tiled (8, W) param tile
    # is correct everywhere.  Only taken when no padding is required
    # (B*C % W == 0) -> no wrapper-side pad / slice copies; reshape is a
    # row-major re-view of contiguous data.
    W = (C * LANE) // math.gcd(C, LANE)  # lcm(C, 128)
    if C < LANE and W <= 4096 and (B * C) % W == 0:
        rows = (B * C) // W
        a2d = a.reshape(rows, W)
        b2d = b.reshape(rows, W)
        pa_w = jnp.tile(pa, (SUBLANE, W // C))
        pb_w = jnp.tile(pb, (SUBLANE, W // C))
        out2d = _pallas_agg_2d(pa_w, pb_w, a2d, b2d, block_budget_bytes=budget,
                               vmem_limit_bytes=limit, gen=gen)
        return out2d.reshape(B, C)

    # General path: stream (tile_rows, C) batch tiles with the full class axis
    # as the last block dim; partial last block handles unaligned B.
    pa_w = jnp.tile(pa, (SUBLANE, 1))
    pb_w = jnp.tile(pb, (SUBLANE, 1))
    return _pallas_agg_2d(pa_w, pb_w, a, b, block_budget_bytes=budget,
                          vmem_limit_bytes=limit, gen=gen)


if __name__ == "__main__":
    n_classes = 4
    batch = 8

    # Matches nn.Parameter(torch.ones(1, n_classes)).
    param_a = jnp.ones((1, n_classes), dtype=jnp.float32)
    param_b = jnp.ones((1, n_classes), dtype=jnp.float32)

    key = jax.random.PRNGKey(0)
    k = jax.random.split(key, 6)
    a = jax.random.normal(k[0], (batch, n_classes), dtype=jnp.float32)
    b = jax.random.normal(k[1], (batch, n_classes), dtype=jnp.float32)

    # 1) Module-default small shape (general path, single full block).
    out = jax.block_until_ready(aggregation_forward(param_a, param_b, a, b))
    ref = param_a * a + param_b * b
    assert out.shape == (batch, n_classes)
    assert jnp.allclose(out, ref, atol=1e-6, rtol=1e-6), "mismatch (small)"

    # 1b) Tiny batch < 8 (block equals full array dims).
    out_s = jax.block_until_ready(aggregation_forward(param_a, param_b, a[:4], b[:4]))
    assert jnp.allclose(out_s, ref[:4], atol=1e-6, rtol=1e-6), "mismatch (tiny)"

    # 2) Lane-packed, multi-tile pipelined path (forced small block budget).
    B2 = 2048
    a2 = jax.random.normal(k[2], (B2, n_classes), dtype=jnp.float32)
    b2 = jax.random.normal(k[3], (B2, n_classes), dtype=jnp.float32)
    out2 = jax.block_until_ready(
        aggregation_forward(param_a, param_b, a2, b2, block_budget_bytes=8192))
    ref2 = param_a * a2 + param_b * b2
    assert jnp.allclose(out2, ref2, atol=1e-6, rtol=1e-6), "mismatch (lane-packed)"

    # 3) General path with a partial last block (no pad / no output slice).
    C3, B3 = 12, 100
    pa3 = (jnp.arange(C3, dtype=jnp.float32) * 0.1 + 1.0).reshape(1, C3)
    pb3 = (jnp.arange(C3, dtype=jnp.float32) * -0.05 + 0.5).reshape(1, C3)
    a3 = jax.random.normal(k[4], (B3, C3), dtype=jnp.float32)
    b3 = jax.random.normal(k[5], (B3, C3), dtype=jnp.float32)
    out3 = jax.block_until_ready(
        aggregation_forward(pa3, pb3, a3, b3, block_budget_bytes=4096))
    ref3 = pa3 * a3 + pb3 * b3
    assert jnp.allclose(out3, ref3, atol=1e-6, rtol=1e-6), "mismatch (partial block)"

    print("KERNEL_OK")
</pallas_src>

<mosaic_0001>
module attributes {stable_mosaic.version = 11 : i64} {
  func.func @_aggregation_kernel(%arg0: i32, %arg1: memref<8x4xf32, #tpu.memory_space<vmem>>, %arg2: memref<8x4xf32, #tpu.memory_space<vmem>>, %arg3: memref<8x4xf32, #tpu.memory_space<vmem>>, %arg4: memref<8x4xf32, #tpu.memory_space<vmem>>, %arg5: memref<8x4xf32, #tpu.memory_space<vmem>>) attributes {dimension_semantics = [#tpu.dimension_semantics<parallel>], iteration_bounds = array<i64: 1>, scalar_prefetch = 0 : i64, scratch_operands = 0 : i64, tpu.core_type = #tpu.core_type<tc>, window_params = [{pipeline_mode = #tpu.pipeline_mode<synchronous>, transform_indices = @transform_0, window_bounds = array<i64: 8, 4>}, {pipeline_mode = #tpu.pipeline_mode<synchronous>, transform_indices = @transform_1, window_bounds = array<i64: 8, 4>}, {transform_indices = @transform_2, window_bounds = array<i64: 8, 4>}, {transform_indices = @transform_3, window_bounds = array<i64: 8, 4>}, {transform_indices = @transform_4, window_bounds = array<i64: 8, 4>}]} {
    %c0 = arith.constant 0 : index
    %c0_0 = arith.constant 0 : index
    %0 = vector.load %arg3[%c0, %c0_0] : memref<8x4xf32, #tpu.memory_space<vmem>>, vector<8x4xf32>
    %c0_1 = arith.constant 0 : index
    %c0_2 = arith.constant 0 : index
    %1 = vector.load %arg1[%c0_1, %c0_2] : memref<8x4xf32, #tpu.memory_space<vmem>>, vector<8x4xf32>
    %2 = arith.mulf %0, %1 : vector<8x4xf32>
    %c0_3 = arith.constant 0 : index
    %c0_4 = arith.constant 0 : index
    %3 = vector.load %arg4[%c0_3, %c0_4] : memref<8x4xf32, #tpu.memory_space<vmem>>, vector<8x4xf32>
    %c0_5 = arith.constant 0 : index
    %c0_6 = arith.constant 0 : index
    %4 = vector.load %arg2[%c0_5, %c0_6] : memref<8x4xf32, #tpu.memory_space<vmem>>, vector<8x4xf32>
    %5 = arith.mulf %3, %4 : vector<8x4xf32>
    %6 = arith.addf %2, %5 : vector<8x4xf32>
    %c0_7 = arith.constant 0 : index
    %c0_8 = arith.constant 0 : index
    %7 = vector.load %arg5[%c0_7, %c0_8] : memref<8x4xf32, #tpu.memory_space<vmem>>, vector<8x4xf32>
    tpu.vector_store %arg5[%c0_7, %c0_8], %6 {strides = array<i32>} : memref<8x4xf32, #tpu.memory_space<vmem>>, vector<8x4xf32>,
    return
  }
  func.func @transform_0(%arg0: i32) -> (i32, i32) {
    %c0_i32 = arith.constant 0 : i32
    %c0_i32_0 = arith.constant 0 : i32
    %c0_i32_1 = arith.constant 0 : i32
    return %c0_i32, %c0_i32_0 : i32, i32
  }
  func.func @transform_1(%arg0: i32) -> (i32, i32) {
    %c0_i32 = arith.constant 0 : i32
    %c0_i32_0 = arith.constant 0 : i32
    %c0_i32_1 = arith.constant 0 : i32
    return %c0_i32, %c0_i32_0 : i32, i32
  }
  func.func @transform_2(%arg0: i32) -> (i32, i32) {
    %c0_i32 = arith.constant 0 : i32
    %c0_i32_0 = arith.constant 0 : i32
    return %arg0, %c0_i32 : i32, i32
  }
  func.func @transform_3(%arg0: i32) -> (i32, i32) {
    %c0_i32 = arith.constant 0 : i32
    %c0_i32_0 = arith.constant 0 : i32
    return %arg0, %c0_i32 : i32, i32
  }
  func.func @transform_4(%arg0: i32) -> (i32, i32) {
    %c0_i32 = arith.constant 0 : i32
    %c0_i32_0 = arith.constant 0 : i32
    return %arg0, %c0_i32 : i32, i32
  }
}

</mosaic_0001>

<bundles_post_ra>
// kernel: tpu_custom_call.1
= control target key start
LH: loop header
LB: loop body
LE: loop exit
PB: predicated region body
PF: predicated region fallthrough
CT: control target
= control target key end

     0   :  { %vm24_vm0 = vcmask 31744   ;;  %s70_s0 = inlined_call_operand.vmem [shape: f32[8,4], index: 0, kind: input, shape index: {}]   ;;  %s71_s1 = inlined_call_operand.vmem [shape: f32[8,4], index: 1, kind: input, shape index: {}]   ;;  %s72_s2 = inlined_call_operand.vmem [shape: f32[8,4], index: 2, kind: input, shape index: {}]   ;;  %s73_s3 = inlined_call_operand.vmem [shape: f32[8,4], index: 3, kind: input, shape index: {}]   ;;  %s74_s4 = inlined_call_operand.vmem [shape: f32[8,4], index: 4, kind: output, shape index: {}]  }
   0x1   :  { %v17_v0 = vld [vmem:[%s72_s2] sm:$0xff] }
   0x2   :  { %v18_v1 = vld [vmem:[%s70_s0] sm:$0xff] }
   0x3   :  { %v20_v2 = vld [vmem:[%s73_s3] sm:$0xff]  ;;  %v19_v3 = vmul.f32 %v18_v1, %v17_v0 }
   0x4   :  { %v21_v4 = vld [vmem:[%s71_s1] sm:$0xff] }
   0x5   :  { %v22_v5 = vmul.f32 %v21_v4, %v20_v2 }
   0x7   :  { %v23_v6 = vadd.f32 %v22_v5, %v19_v3 }
   0x9   :  { %25 = vst.msk [vmem:[%s74_s4] sm:$0xff] %vm24_vm0, %v23_v6 }

</bundles_post_ra>
